<compile_context>
chip_gen: v7x
topology: tpu7x:2x2x1
jax: 0.10.0
libtpu: 0.0.40
codegen_flags: <defaults>
</compile_context>

<pallas_src>
import jax
import jax.numpy as jnp
from jax.experimental import pallas as pl
from jax.experimental.pallas import tpu as pltpu

H1, H2 = 400, 300          # torch layer widths
H1P, H2P = 512, 384        # lane-padded widths (multiples of 128)


def _round_up(x, m):
    return ((x + m - 1) // m) * m


def _critic_kernel(x_ref, u_ref, w1x_ref, w1u_ref, b1_ref,
                   w2_ref, b2_ref, w3_ref, b3_ref, o_ref):
    # Layer 1: relu( x @ W1x + u @ W1u + b1 ) — f32 on the MXU (K is tiny).
    h1 = jnp.dot(x_ref[...], w1x_ref[...], preferred_element_type=jnp.float32)
    h1 = h1 + jnp.dot(u_ref[...], w1u_ref[...], preferred_element_type=jnp.float32)
    h1 = jnp.maximum(h1 + b1_ref[...], 0.0)

    # Layer 2: relu( h1 @ W2 + b2 ) — bf16 operands, f32 accumulate on the MXU.
    h2 = jnp.dot(h1.astype(jnp.bfloat16), w2_ref[...],
                 preferred_element_type=jnp.float32)
    h2 = jnp.maximum(h2 + b2_ref[...], 0.0)

    # Layer 3: single output unit -> VPU broadcast-multiply + XLU lane reduce.
    # Padded w3 columns are zero, so the reduce over H2P is exact.
    q = jnp.sum(h2 * w3_ref[...], axis=-1, keepdims=True) + b3_ref[0, 0]
    o_ref[...] = q.astype(o_ref.dtype)


def critic_forward(x, u, params, *, batch_tile=1024):
    """Pallas-backed Critic.forward(x, u).

    params = (w1, b1, w2, b2, w3_row, b3) with
      w1: (state_dim+action_dim, 400), b1: (1, 400)
      w2: (400, 300),                  b2: (1, 300)
      w3_row: (1, 300),                b3: (1, 1)
    """
    w1, b1, w2, b2, w3_row, b3 = params
    B, state_dim = x.shape
    action_dim = u.shape[1]
    in1 = state_dim + action_dim

    # --- one-time (tiny) weight prep: lane-pad hidden dims, split W1, bf16 W2 ---
    w1p = jnp.pad(w1.astype(jnp.float32), ((0, 0), (0, H1P - H1)))
    w1x = w1p[:state_dim]                # (state_dim, 512)
    w1u = w1p[state_dim:]                # (action_dim, 512)
    b1p = jnp.pad(b1.astype(jnp.float32), ((0, 0), (0, H1P - H1)))
    w2p = jnp.pad(w2.astype(jnp.float32),
                  ((0, H1P - H1), (0, H2P - H2))).astype(jnp.bfloat16)
    b2p = jnp.pad(b2.astype(jnp.float32), ((0, 0), (0, H2P - H2)))
    w3p = jnp.pad(w3_row.astype(jnp.float32), ((0, 0), (0, H2P - H2)))
    b3s = b3.astype(jnp.float32).reshape(1, 1)

    x = x.astype(jnp.float32)
    u = u.astype(jnp.float32)

    # --- padding-aware batch tiling (overhead-bound kernel -> few, big steps) ---
    n_tiles = max(1, pl.cdiv(B, batch_tile))
    if n_tiles == 1:
        TB = B                            # block == full array: no pad needed
        B_pad = B
    else:
        TB = _round_up(pl.cdiv(B, n_tiles), 16)
        B_pad = n_tiles * TB
    if B_pad != B:
        x = jnp.pad(x, ((0, B_pad - B), (0, 0)))
        u = jnp.pad(u, ((0, B_pad - B), (0, 0)))

    flops = 2 * B_pad * (in1 * H1P + H1P * H2P + H2P)
    bytes_accessed = (
        B_pad * (in1 + 1) * 4                 # x, u in + q out (f32)
        + (in1 + 1) * H1P * 4                 # W1 + b1 (f32)
        + H1P * H2P * 2 + H2P * 4             # W2 (bf16) + b2
        + H2P * 4 + 4                         # w3 row + b3
    )

    out = pl.pallas_call(
        _critic_kernel,
        out_shape=jax.ShapeDtypeStruct((B_pad, 1), jnp.float32),
        grid=(n_tiles,),
        in_specs=[
            pl.BlockSpec((TB, state_dim), lambda i: (i, 0)),    # x tile (f32)
            pl.BlockSpec((TB, action_dim), lambda i: (i, 0)),   # u tile (f32)
            pl.BlockSpec((state_dim, H1P), lambda i: (0, 0)),   # W1[:state], resident
            pl.BlockSpec((action_dim, H1P), lambda i: (0, 0)),  # W1[state:], resident
            pl.BlockSpec((1, H1P), lambda i: (0, 0)),           # b1
            pl.BlockSpec((H1P, H2P), lambda i: (0, 0)),         # W2 (bf16), resident
            pl.BlockSpec((1, H2P), lambda i: (0, 0)),           # b2
            pl.BlockSpec((1, H2P), lambda i: (0, 0)),           # w3 row
            pl.BlockSpec(memory_space=pltpu.MemorySpace.SMEM),  # b3 scalar
        ],
        out_specs=pl.BlockSpec((TB, 1), lambda i: (i, 0)),
        compiler_params=pltpu.CompilerParams(
            dimension_semantics=("parallel",),
            vmem_limit_bytes=32 * 1024 * 1024,
        ),
        cost_estimate=pl.CostEstimate(
            flops=flops, transcendentals=0, bytes_accessed=bytes_accessed),
    )(x, u, w1x, w1u, b1p, w2p, b2p, w3p, b3s)

    return out[:B]


def init_critic_params(key, state_dim, action_dim):
    """Deterministic init mimicking nn.Linear default: U(-1/sqrt(fan_in), 1/sqrt(fan_in))."""
    in1 = state_dim + action_dim
    ks = jax.random.split(key, 6)

    def unif(k, shape, fan_in):
        bound = 1.0 / jnp.sqrt(jnp.float32(fan_in))
        return jax.random.uniform(k, shape, jnp.float32, -bound, bound)

    # Weights stored pre-transposed as (in_features, out_features).
    w1 = unif(ks[0], (in1, H1), in1)
    b1 = unif(ks[1], (1, H1), in1)
    w2 = unif(ks[2], (H1, H2), H1)
    b2 = unif(ks[3], (1, H2), H1)
    w3_row = unif(ks[4], (1, H2), H2)   # l3 weight kept as a (1, 300) row
    b3 = unif(ks[5], (1, 1), H2)
    return (w1, b1, w2, b2, w3_row, b3)


if __name__ == "__main__":
    B, state_dim, action_dim = 2, 16, 8

    key = jax.random.PRNGKey(0)
    kx, ku, kp = jax.random.split(key, 3)
    x = jax.random.normal(kx, (B, state_dim), jnp.float32)
    u = jax.random.normal(ku, (B, action_dim), jnp.float32)
    params = init_critic_params(kp, state_dim, action_dim)

    q = jax.jit(critic_forward)(x, u, params)
    jax.block_until_ready(q)

    # Pure-JAX f32 reference (layer 2 uses bf16 operands -> loosened tolerance).
    w1, b1, w2, b2, w3_row, b3 = params
    xu = jnp.concatenate([x, u], axis=1)
    ref = jnp.maximum(xu @ w1 + b1, 0.0)
    ref = jnp.maximum(ref @ w2 + b2, 0.0)
    ref = ref @ w3_row.T + b3

    assert q.shape == (B, 1)
    assert jnp.allclose(q, ref, atol=2e-2, rtol=2e-2), (q, ref)

    print("KERNEL_OK")
</pallas_src>

<mosaic_0001>
module attributes {stable_mosaic.version = 11 : i64} {
  func.func @_critic_kernel(%arg0: i32, %arg1: memref<2x16xf32, #tpu.memory_space<vmem>>, %arg2: memref<2x8xf32, #tpu.memory_space<vmem>>, %arg3: memref<16x512xf32, #tpu.memory_space<vmem>>, %arg4: memref<8x512xf32, #tpu.memory_space<vmem>>, %arg5: memref<1x512xf32, #tpu.memory_space<vmem>>, %arg6: memref<512x384xbf16, #tpu.memory_space<vmem>>, %arg7: memref<1x384xf32, #tpu.memory_space<vmem>>, %arg8: memref<1x384xf32, #tpu.memory_space<vmem>>, %arg9: memref<1x1xf32, #tpu.memory_space<smem>>, %arg10: memref<2x1xf32, #tpu.memory_space<vmem>>) attributes {dimension_semantics = [#tpu.dimension_semantics<parallel>], iteration_bounds = array<i64: 1>, scalar_prefetch = 0 : i64, scratch_operands = 0 : i64, tpu.core_type = #tpu.core_type<tc>, window_params = [{transform_indices = @transform_0, window_bounds = array<i64: 2, 16>}, {transform_indices = @transform_1, window_bounds = array<i64: 2, 8>}, {pipeline_mode = #tpu.pipeline_mode<synchronous>, transform_indices = @transform_2, window_bounds = array<i64: 16, 512>}, {pipeline_mode = #tpu.pipeline_mode<synchronous>, transform_indices = @transform_3, window_bounds = array<i64: 8, 512>}, {pipeline_mode = #tpu.pipeline_mode<synchronous>, transform_indices = @transform_4, window_bounds = array<i64: 1, 512>}, {pipeline_mode = #tpu.pipeline_mode<synchronous>, transform_indices = @transform_5, window_bounds = array<i64: 512, 384>}, {pipeline_mode = #tpu.pipeline_mode<synchronous>, transform_indices = @transform_6, window_bounds = array<i64: 1, 384>}, {pipeline_mode = #tpu.pipeline_mode<synchronous>, transform_indices = @transform_7, window_bounds = array<i64: 1, 384>}, {transform_indices = @transform_8, window_bounds = array<i64: 1, 1>}, {transform_indices = @transform_9, window_bounds = array<i64: 2, 1>}]} {
    %c0 = arith.constant 0 : index
    %c0_0 = arith.constant 0 : index
    %0 = vector.load %arg1[%c0, %c0_0] : memref<2x16xf32, #tpu.memory_space<vmem>>, vector<2x16xf32>
    %c0_1 = arith.constant 0 : index
    %c0_2 = arith.constant 0 : index
    %1 = vector.load %arg3[%c0_1, %c0_2] : memref<16x512xf32, #tpu.memory_space<vmem>>, vector<16x512xf32>
    %cst = arith.constant dense<0.000000e+00> : vector<2x512xf32>
    %2 = tpu.matmul %0, %1, %cst {dimension_numbers = #tpu.dot_dimension_numbers<[1], [0], [0], [1], [0, 0, 1, 1], [], []>} : vector<2x16xf32>, vector<16x512xf32>, vector<2x512xf32> -> vector<2x512xf32>
    %c0_3 = arith.constant 0 : index
    %c0_4 = arith.constant 0 : index
    %3 = vector.load %arg2[%c0_3, %c0_4] : memref<2x8xf32, #tpu.memory_space<vmem>>, vector<2x8xf32>
    %c0_5 = arith.constant 0 : index
    %c0_6 = arith.constant 0 : index
    %4 = vector.load %arg4[%c0_5, %c0_6] : memref<8x512xf32, #tpu.memory_space<vmem>>, vector<8x512xf32>
    %cst_7 = arith.constant dense<0.000000e+00> : vector<2x512xf32>
    %5 = tpu.matmul %3, %4, %cst_7 {dimension_numbers = #tpu.dot_dimension_numbers<[1], [0], [0], [1], [0, 0, 1, 1], [], []>} : vector<2x8xf32>, vector<8x512xf32>, vector<2x512xf32> -> vector<2x512xf32>
    %6 = arith.addf %2, %5 : vector<2x512xf32>
    %c0_8 = arith.constant 0 : index
    %c0_9 = arith.constant 0 : index
    %7 = vector.load %arg5[%c0_8, %c0_9] : memref<1x512xf32, #tpu.memory_space<vmem>>, vector<1x512xf32>
    %8 = vector.broadcast %7 : vector<1x512xf32> to vector<2x512xf32>
    %9 = arith.addf %6, %8 : vector<2x512xf32>
    %cst_10 = arith.constant 0.000000e+00 : f32
    %10 = vector.broadcast %cst_10 : f32 to vector<2x512xf32>
    %11 = arith.maximumf %9, %10 : vector<2x512xf32>
    %12 = arith.truncf %11 : vector<2x512xf32> to vector<2x512xbf16>
    %c0_11 = arith.constant 0 : index
    %c0_12 = arith.constant 0 : index
    %13 = vector.load %arg6[%c0_11, %c0_12] : memref<512x384xbf16, #tpu.memory_space<vmem>>, vector<512x384xbf16>
    %cst_13 = arith.constant dense<0.000000e+00> : vector<2x384xf32>
    %14 = tpu.matmul %12, %13, %cst_13 {dimension_numbers = #tpu.dot_dimension_numbers<[1], [0], [0], [1], [0, 0, 1, 1], [], []>} : vector<2x512xbf16>, vector<512x384xbf16>, vector<2x384xf32> -> vector<2x384xf32>
    %c0_14 = arith.constant 0 : index
    %c0_15 = arith.constant 0 : index
    %15 = vector.load %arg7[%c0_14, %c0_15] : memref<1x384xf32, #tpu.memory_space<vmem>>, vector<1x384xf32>
    %16 = vector.broadcast %15 : vector<1x384xf32> to vector<2x384xf32>
    %17 = arith.addf %14, %16 : vector<2x384xf32>
    %cst_16 = arith.constant 0.000000e+00 : f32
    %18 = vector.broadcast %cst_16 : f32 to vector<2x384xf32>
    %19 = arith.maximumf %17, %18 : vector<2x384xf32>
    %c0_17 = arith.constant 0 : index
    %c0_18 = arith.constant 0 : index
    %20 = vector.load %arg8[%c0_17, %c0_18] : memref<1x384xf32, #tpu.memory_space<vmem>>, vector<1x384xf32>
    %21 = vector.broadcast %20 : vector<1x384xf32> to vector<2x384xf32>
    %22 = arith.mulf %19, %21 : vector<2x384xf32>
    %cst_19 = arith.constant dense<0.000000e+00> : vector<2xf32>
    %23 = vector.multi_reduction <add>, %22, %cst_19 [1] : vector<2x384xf32> to vector<2xf32>
    %24 = vector.shape_cast %23 : vector<2xf32> to vector<2x1xf32>
    %c0_20 = arith.constant 0 : index
    %c0_21 = arith.constant 0 : index
    %25 = memref.load %arg9[%c0_20, %c0_21] : memref<1x1xf32, #tpu.memory_space<smem>>
    %26 = vector.broadcast %25 : f32 to vector<2x1xf32>
    %27 = arith.addf %24, %26 : vector<2x1xf32>
    %c0_22 = arith.constant 0 : index
    %c0_23 = arith.constant 0 : index
    %28 = vector.load %arg10[%c0_22, %c0_23] : memref<2x1xf32, #tpu.memory_space<vmem>>, vector<2x1xf32>
    tpu.vector_store %arg10[%c0_22, %c0_23], %27 {strides = array<i32>} : memref<2x1xf32, #tpu.memory_space<vmem>>, vector<2x1xf32>,
    return
  }
  func.func @transform_0(%arg0: i32) -> (i32, i32) {
    %c0_i32 = arith.constant 0 : i32
    %c0_i32_0 = arith.constant 0 : i32
    return %arg0, %c0_i32 : i32, i32
  }
  func.func @transform_1(%arg0: i32) -> (i32, i32) {
    %c0_i32 = arith.constant 0 : i32
    %c0_i32_0 = arith.constant 0 : i32
    return %arg0, %c0_i32 : i32, i32
  }
  func.func @transform_2(%arg0: i32) -> (i32, i32) {
    %c0_i32 = arith.constant 0 : i32
    %c0_i32_0 = arith.constant 0 : i32
    %c0_i32_1 = arith.constant 0 : i32
    return %c0_i32, %c0_i32_0 : i32, i32
  }
  func.func @transform_3(%arg0: i32) -> (i32, i32) {
    %c0_i32 = arith.constant 0 : i32
    %c0_i32_0 = arith.constant 0 : i32
    %c0_i32_1 = arith.constant 0 : i32
    return %c0_i32, %c0_i32_0 : i32, i32
  }
  func.func @transform_4(%arg0: i32) -> (i32, i32) {
    %c0_i32 = arith.constant 0 : i32
    %c0_i32_0 = arith.constant 0 : i32
    %c0_i32_1 = arith.constant 0 : i32
    return %c0_i32, %c0_i32_0 : i32, i32
  }
  func.func @transform_5(%arg0: i32) -> (i32, i32) {
    %c0_i32 = arith.constant 0 : i32
    %c0_i32_0 = arith.constant 0 : i32
    %c0_i32_1 = arith.constant 0 : i32
    return %c0_i32, %c0_i32_0 : i32, i32
  }
  func.func @transform_6(%arg0: i32) -> (i32, i32) {
    %c0_i32 = arith.constant 0 : i32
    %c0_i32_0 = arith.constant 0 : i32
    %c0_i32_1 = arith.constant 0 : i32
    return %c0_i32, %c0_i32_0 : i32, i32
  }
  func.func @transform_7(%arg0: i32) -> (i32, i32) {
    %c0_i32 = arith.constant 0 : i32
    %c0_i32_0 = arith.constant 0 : i32
    %c0_i32_1 = arith.constant 0 : i32
    return %c0_i32, %c0_i32_0 : i32, i32
  }
  func.func @transform_8(%arg0: i32) -> (i32, i32) {
    %c0_i32 = arith.constant 0 : i32
    %c0_i32_0 = arith.constant 0 : i32
    %c0_i32_1 = arith.constant 0 : i32
    return %c0_i32, %c0_i32_0 : i32, i32
  }
  func.func @transform_9(%arg0: i32) -> (i32, i32) {
    %c0_i32 = arith.constant 0 : i32
    %c0_i32_0 = arith.constant 0 : i32
    return %arg0, %c0_i32 : i32, i32
  }
}

</mosaic_0001>

<bundles_post_ra>
// kernel: critic_forward.1
= control target key start
LH: loop header
LB: loop body
LE: loop exit
PB: predicated region body
PF: predicated region fallthrough
CT: control target
= control target key end

     0   :  { %v1524_v2 = vmov 0.0   ;;  %vm48_vm0 = vcmask 64512   ;;  %vm194_vm1 = vcmask 130048   ;;  %vm1216_vm2 = vcmask 1041408   ;;  %s1946_s3 = inlined_call_operand.vmem [shape: f32[8,512], index: 3, kind: input, shape index: {}]   ;;  %s1947_s1 = inlined_call_operand.vmem [shape: f32[2,8], index: 1, kind: input, shape index: {}]   ;;  %s1948_s2 = inlined_call_operand.vmem [shape: f32[16,512], index: 2, kind: input, shape index: {}]   ;;  %s1949_s5 = inlined_call_operand.vmem [shape: bf16[512,384], index: 5, kind: input, shape index: {}]   ;;  %s1950_s0 = inlined_call_operand.vmem [shape: f32[2,16], index: 0, kind: input, shape index: {}]   ;;  %s1951_s4 = inlined_call_operand.vmem [shape: f32[1,512], index: 4, kind: input, shape index: {}]   ;;  %s1952_s6 = inlined_call_operand.vmem [shape: f32[1,384], index: 6, kind: input, shape index: {}]   ;;  %s1953_s7 = inlined_call_operand.vmem [shape: f32[1,384], index: 7, kind: input, shape index: {}]   ;;  %s1954_s8 = inlined_call_operand.<no memory space> [shape: f32[1,1], index: 8, kind: input, shape index: {}]   ;;  %s1955_s9 = inlined_call_operand.vmem [shape: f32[2,1], index: 9, kind: output, shape index: {}]  }
   0x1   :  { %v45_v0 = vld [vmem:[%s1946_s3 + $0x8] sm:$0xff]  ;;  %v44_v1 = vld [vmem:[%s1946_s3] sm:$0xff]  ;;  %116 = vmatprep.mubr.f32.mxu1 %v1524_v2  ;;  %v47_v4 = vld [vmem:[%s1946_s3 + $0x18] sm:$0xff]  ;;  %vm1227_vm3 = vcmask 1024  }
   0x2   :  { %v43_v3 = vld [vmem:[%s1947_s1] sm:$0x3]  ;;  %52 = vmatprep.subr.mxu1 %v45_v0  ;;  %v46_v5 = vld [vmem:[%s1946_s3 + $0x10] sm:$0xff]  ;;  %v36_v6 = vld [vmem:[%s1948_s2 + $0x8] sm:$0xff] }
   0x3   :  { %53 = vmatpush1.msra.mxu1 %v44_v1  ;;  %v40_v7 = vld [vmem:[%s1948_s2 + $0x28] sm:$0xff]  ;;  %v35_v8 = vld [vmem:[%s1948_s2] sm:$0xff]  ;;  %v38_v11 = vld [vmem:[%s1948_s2 + $0x18] sm:$0xff] }
   0x4   :  { %v39_v9 = vld [vmem:[%s1948_s2 + $0x20] sm:$0xff]  ;;  %1233 = vmatmul.mubr.msk.f32.vlgmr.msra.gmra.mrb[0].mxu1 %vm48_vm0, %v43_v3  ;;  %123 = vmatprep.subr.mxu1 %v47_v4  ;;  %v1377_v10 = vpack.c.bf16 %v40_v7, %v36_v6  ;;  %v42_v12 = vld [vmem:[%s1948_s2 + $0x38] sm:$0xff]  ;;  %v37_v14 = vld [vmem:[%s1948_s2 + $0x10] sm:$0xff] }
   0x5   :  { %124 = vmatpush1.msra.mxu1 %v46_v5  ;;  %187 = vmatprep.mubr.f32.mxu1 %v1524_v2  ;;  %v1379_v13 = vpack.c.bf16 %v39_v9, %v35_v8  ;;  %v41_v15 = vld [vmem:[%s1948_s2 + $0x30] sm:$0xff]  ;;  %v1381_v16 = vpack.c.bf16 %v42_v12, %v38_v11  ;;  %v1398_v18 = vld [vmem:[%s1949_s5] ss:$12 sps:$4 sm:$0xff]   ;;  %v1399_v19 = vld [vmem:[%s1949_s5 + $0x1c] ss:$12 sps:$4 sm:$0xff]   ;;  %v342_v5 = vlaneseq }
   0x6   :  { %1378 = vmatprep.subr.bf16.mxu1 %v1377_v10  ;;  %v1396_v17 = vld [vmem:[%s1949_s5 + $0x4] ss:$12 sps:$4 sm:$0xff]   ;;  %v34_v20 = vld [vmem:[%s1950_s0] sm:$0x3]  ;;  %v1383_v21 = vpack.c.bf16 %v41_v15, %v37_v14  ;;  %v1405_v25 = vld [vmem:[%s1949_s5 + $0x4c] ss:$12 sps:$4 sm:$0xff]  }
   0x7   :  { %1031 = vmatprep.subr.bf16.mxu0 %v1396_v17  ;;  %v1401_v22 = vld [vmem:[%s1949_s5 + $0x18] ss:$12 sps:$4 sm:$0xff]   ;;  %v1402_v23 = vld [vmem:[%s1949_s5 + $0x34] ss:$12 sps:$4 sm:$0xff]   ;;  %v1404_v24 = vld [vmem:[%s1949_s5 + $0x30] ss:$12 sps:$4 sm:$0xff]  }
   0x8   :  { %1234 = vmatmul.mubr.msk.f32.vlgmr.msra.gmra.mrb[2].mxu1 %vm48_vm0, %v43_v3  ;;  %1032 = vmatpush1.bf16.msra.mxu0 %v1398_v18  ;;  %v1407_v26 = vld [vmem:[%s1949_s5 + $0x48] ss:$12 sps:$4 sm:$0xff]   ;;  %v1408_v27 = vld [vmem:[%s1949_s5 + $0x64] ss:$12 sps:$4 sm:$0xff]   ;;  %v1410_v30 = vld [vmem:[%s1949_s5 + $0x60] ss:$12 sps:$4 sm:$0xff]  }
   0x9   :  { %1380 = vmatpush1.bf16.msra.mxu1 %v1379_v13  ;;  %262 = vmatprep.mubr.f32.mxu1 %v1524_v2  ;;  %v1422_v28 = vld [vmem:[%s1949_s5 + $0xc8] ss:$12 sps:$4 sm:$0xff]   ;;  %v1427_v31 = vld [vmem:[%s1949_s5 + $0xe0] ss:$12 sps:$4 sm:$0xff]   ;;  %v1432_v34 = vld [vmem:[%s1949_s5 + $0xf8] ss:$12 sps:$4 sm:$0xff]  }
   0xa   :  { %1382 = vmatprep.subr.bf16.mxu1 %v1381_v16  ;;  %1033 = vmatprep.subr.bf16.mxu0 %v1399_v19  ;;  %v1424_v29 = vld [vmem:[%s1949_s5 + $0x8] ss:$12 sps:$4 sm:$0xff]   ;;  %v1429_v32 = vld [vmem:[%s1949_s5 + $0x20] ss:$12 sps:$4 sm:$0xff]   ;;  %v1413_v35 = vld [vmem:[%s1949_s5 + $0x78] ss:$12 sps:$4 sm:$0xff]  }
   0xb   :  { %v1411_v33 = vld [vmem:[%s1949_s5 + $0x7c] ss:$12 sps:$4 sm:$0xff]   ;;  %v1434_v36 = vld [vmem:[%s1949_s5 + $0x38] ss:$12 sps:$4 sm:$0xff]   ;;  %v1414_v37 = vld [vmem:[%s1949_s5 + $0x94] ss:$12 sps:$4 sm:$0xff]  }
   0xc   :  { %1235 = vmatmul.mubr.msk.f32.vlgmr.msra.gmra.mrb[0].mxu1 %vm194_vm1, %v34_v20  ;;  %1034 = vmatpush1.bf16.msra.mxu0 %v1401_v22  ;;  %v1437_v38 = vld [vmem:[%s1949_s5 + $0x110] ss:$12 sps:$4 sm:$0xff]   ;;  %v1417_v41 = vld [vmem:[%s1949_s5 + $0xac] ss:$12 sps:$4 sm:$0xff]   ;;  %v1442_v42 = vld [vmem:[%s1949_s5 + $0x128] ss:$12 sps:$4 sm:$0xff]  }
   0xd   :  { %1384 = vmatpush1.bf16.msra.mxu1 %v1383_v21  ;;  %333 = vmatprep.mubr.f32.mxu1 %v1524_v2  ;;  %v1439_v39 = vld [vmem:[%s1949_s5 + $0x50] ss:$12 sps:$4 sm:$0xff]   ;;  %v1419_v43 = vld [vmem:[%s1949_s5 + $0xa8] ss:$12 sps:$4 sm:$0xff]   ;;  %v1447_v45 = vld [vmem:[%s1949_s5 + $0x140] ss:$12 sps:$4 sm:$0xff]  }
   0xe   :  { %1035 = vmatprep.subr.bf16.mxu0 %v1402_v23  ;;  %1333 = vmatprep.subr.bf16.mxu1 %v1422_v28  ;;  %v1416_v40 = vld [vmem:[%s1949_s5 + $0x90] ss:$12 sps:$4 sm:$0xff]   ;;  %v1444_v44 = vld [vmem:[%s1949_s5 + $0x68] ss:$12 sps:$4 sm:$0xff]   ;;  %v1423_v47 = vld [vmem:[%s1949_s5 + $0xc0] ss:$12 sps:$4 sm:$0xff]  }
   0xf   :  { %v1420_v46 = vld [vmem:[%s1949_s5 + $0xc4] ss:$12 sps:$4 sm:$0xff]   ;;  %v1449_v48 = vld [vmem:[%s1949_s5 + $0x80] ss:$12 sps:$4 sm:$0xff]   ;;  %v1425_v49 = vld [vmem:[%s1949_s5 + $0xdc] ss:$12 sps:$4 sm:$0xff]  }
  0x10   :  { %1236 = vmatmul.mubr.msk.f32.vlgmr.msra.gmra.mrb[2].mxu1 %vm194_vm1, %v34_v20  ;;  %1036 = vmatpush1.bf16.msra.mxu0 %v1404_v24  ;;  %v1428_v50 = vld [vmem:[%s1949_s5 + $0xd8] ss:$12 sps:$4 sm:$0xff]   ;;  %v1430_v51 = vld [vmem:[%s1949_s5 + $0xf4] ss:$12 sps:$4 sm:$0xff]   ;;  %v1433_v52 = vld [vmem:[%s1949_s5 + $0xf0] ss:$12 sps:$4 sm:$0xff]  }
  0x11   :  { %1037 = vmatprep.subr.bf16.mxu0 %v1405_v25  ;;  %1334 = vmatpush3.bf16.msra.mxu1 %v1424_v29  ;;  %v1435_v53 = vld [vmem:[%s1949_s5 + $0x10c] ss:$12 sps:$4 sm:$0xff]   ;;  %v1438_v54 = vld [vmem:[%s1949_s5 + $0x108] ss:$12 sps:$4 sm:$0xff]   ;;  %v1440_v55 = vld [vmem:[%s1949_s5 + $0x124] ss:$12 sps:$4 sm:$0xff]  }
  0x12   :  { %1335 = vmatprep.subr.bf16.mxu1 %v1427_v31  ;;  %v1443_v56 = vld [vmem:[%s1949_s5 + $0x120] ss:$12 sps:$4 sm:$0xff]   ;;  %v1445_v57 = vld [vmem:[%s1949_s5 + $0x13c] ss:$12 sps:$4 sm:$0xff]   ;;  %v1448_v58 = vld [vmem:[%s1949_s5 + $0x138] ss:$12 sps:$4 sm:$0xff]  }
  0x13   :  { %v1450_v59 = vld [vmem:[%s1949_s5 + $0x154] ss:$12 sps:$4 sm:$0xff]   ;;  %v1452_v60 = vld [vmem:[%s1949_s5 + $0x158] ss:$12 sps:$4 sm:$0xff]   ;;  %v1453_v61 = vld [vmem:[%s1949_s5 + $0x150] ss:$12 sps:$4 sm:$0xff]  }
  0x14   :  { %1038 = vmatpush1.bf16.msra.mxu0 %v1407_v26  ;;  %v1454_v62 = vld [vmem:[%s1949_s5 + $0x98] ss:$12 sps:$4 sm:$0xff]   ;;  %v1457_v0 = vld [vmem:[%s1949_s5 + $0x170] ss:$12 sps:$4 sm:$0xff]   ;;  %v1458_v1 = vld [vmem:[%s1949_s5 + $0x168] ss:$12 sps:$4 sm:$0xff]  }
  0x15   :  { %1039 = vmatprep.subr.bf16.mxu0 %v1408_v27  ;;  %1336 = vmatpush3.bf16.msra.mxu1 %v1429_v32  ;;  %v1455_v63 = vld [vmem:[%s1949_s5 + $0x16c] ss:$12 sps:$4 sm:$0xff]   ;;  %v1459_v2 = vld [vmem:[%s1949_s5 + $0xb0] ss:$12 sps:$4 sm:$0xff]   ;;  %v1463_v4 = vld [vmem:[%s1949_s5 + $0x248] ss:$12 sps:$4 sm:$0xff]  }
  0x16   :  { %1337 = vmatprep.subr.bf16.mxu1 %v1432_v34  ;;  %v1462_v3 = vld [vmem:[%s1949_s5 + $0x184] ss:$12 sps:$4 sm:$0xff]   ;;  %v343_v6 = vshrl.u32 %v342_v5, 7  ;;  %v1774_v8 = vld [vmem:[%s1951_s4] sm:$0xf] }
  0x17   :  { %v1460_v24 = vld [vmem:[%s1949_s5 + $0x180] ss:$12 sps:$4 sm:$0xff]   ;;  %v1464_v25 = vld [vmem:[%s1949_s5 + $0x188] ss:$12 sps:$4 sm:$0xff]   ;;  %v1465_v31 = vld [vmem:[%s1949_s5 + $0x198] ss:$12 sps:$4 sm:$0xff]  }
  0x18   :  { %1040 = vmatpush1.bf16.msra.mxu0 %v1410_v30  ;;  %v1769_v7 = vsub.s32 0, %v343_v6  ;;  %v1776_v9 = vsub.s32 1, %v343_v6  ;;  %v356_v12 = vsub.s32 3, %v343_v6  ;;  %v1467_v27 = vld [vmem:[%s1949_s5 + $0x19c] ss:$12 sps:$4 sm:$0xff]  }
  0x19   :  { %1041 = vmatprep.subr.bf16.mxu0 %v1411_v33  ;;  %1338 = vmatpush3.bf16.msra.mxu1 %v1434_v36  ;;  %v1468_v28 = vld [vmem:[%s1949_s5 + $0x260] ss:$12 sps:$4 sm:$0xff]   ;;  %v1473_v34 = vld [vmem:[%s1949_s5 + $0x278] ss:$12 sps:$4 sm:$0xff]   ;;  %v1509_v5 = vld [vmem:[%s1949_s5 + $0x288] ss:$12 sps:$4 sm:$0xff]  }
  0x1a   :  { %1339 = vmatprep.subr.bf16.mxu1 %v1437_v38  ;;  %v345_v10 = vrot.slane %v1774_v8, %v1769_v7  ;;  %v349_v11 = vrot.slane %v1774_v8, %v1776_v9  ;;  %v357_v17 = vrot.slane %v1774_v8, %v356_v12  ;;  %v1469_v32 = vld [vmem:[%s1949_s5 + $0x1a0] ss:$12 sps:$4 sm:$0xff]   ;;  %v1474_v36 = vld [vmem:[%s1949_s5 + $0x1b8] ss:$12 sps:$4 sm:$0xff]   ;;  %v1478_v38 = vld [vmem:[%s1949_s5 + $0x290] ss:$12 sps:$4 sm:$0xff]  }
  0x1b   :  { %v1472_v33 = vld [vmem:[%s1949_s5 + $0x1b4] ss:$12 sps:$4 sm:$0xff]  }
  0x1c   :  { %1042 = vmatpush1.bf16.msra.mxu0 %v1413_v35  ;;  %v1470_v35 = vld [vmem:[%s1949_s5 + $0x1b0] ss:$12 sps:$4 sm:$0xff]   ;;  %v1520_v12 = vld [vmem:[%s1949_s5 + $0x2d4] ss:$12 sps:$4 sm:$0xff]  }
  0x1d   :  { %1043 = vmatprep.subr.bf16.mxu0 %v1414_v37  ;;  %1340 = vmatpush3.bf16.msra.mxu1 %v1439_v39  ;;  %v1477_v37 = vld [vmem:[%s1949_s5 + $0x1cc] ss:$12 sps:$4 sm:$0xff]   ;;  %v1475_v39 = vld [vmem:[%s1949_s5 + $0x1c8] ss:$12 sps:$4 sm:$0xff]  }
  0x1e   :  { %1341 = vmatprep.subr.bf16.mxu1 %v1442_v42  ;;  %v1483_v42 = vld [vmem:[%s1949_s5 + $0x2a8] ss:$12 sps:$4 sm:$0xff]  }
  0x20   :  { %1044 = vmatpush1.bf16.msra.mxu0 %v1416_v40  ;;  %v1479_v40 = vld [vmem:[%s1949_s5 + $0x1d0] ss:$12 sps:$4 sm:$0xff]  }
  0x21   :  { %1045 = vmatprep.subr.bf16.mxu0 %v1417_v41  ;;  %1342 = vmatpush3.bf16.msra.mxu1 %v1444_v44  ;;  %v1482_v41 = vld [vmem:[%s1949_s5 + $0x1e4] ss:$12 sps:$4 sm:$0xff]   ;;  %v1484_v44 = vld [vmem:[%s1949_s5 + $0x1e8] ss:$12 sps:$4 sm:$0xff]  }
  0x22   :  { %1343 = vmatprep.subr.bf16.mxu1 %v1447_v45  ;;  %v1839_v45 = vsub.s32 2, %v343_v6  ;;  %v1514_v6 = vld [vmem:[%s1949_s5 + $0x2a4] ss:$12 sps:$4 sm:$0xff]  }
  0x24   :  { %1046 = vmatpush1.bf16.msra.mxu0 %v1419_v43  ;;  %v1480_v43 = vld [vmem:[%s1949_s5 + $0x1e0] ss:$12 sps:$4 sm:$0xff]  }
  0x25   :  { %1047 = vmatprep.subr.bf16.mxu0 %v1420_v46  ;;  %1344 = vmatpush3.bf16.msra.mxu1 %v1449_v48  ;;  %v1487_v46 = vld [vmem:[%s1949_s5 + $0x1fc] ss:$12 sps:$4 sm:$0xff]   ;;  %v1485_v48 = vld [vmem:[%s1949_s5 + $0x1f8] ss:$12 sps:$4 sm:$0xff]  }
  0x26   :  { %1345 = vmatprep.subr.bf16.mxu1 %v1452_v60 }
  0x28   :  { %1048 = vmatpush1.bf16.msra.mxu0 %v1423_v47  ;;  %v1488_v47 = vld [vmem:[%s1949_s5 + $0x2c0] ss:$12 sps:$4 sm:$0xff]  }
  0x29   :  { %1049 = vmatprep.subr.bf16.mxu0 %v1425_v49  ;;  %1346 = vmatpush3.bf16.msra.mxu1 %v1454_v62  ;;  %v1489_v49 = vld [vmem:[%s1949_s5 + $0x200] ss:$12 sps:$4 sm:$0xff]  }
  0x2a   :  { %1347 = vmatprep.subr.bf16.mxu1 %v1457_v0  ;;  %v1500_v62 = vld [vmem:[%s1949_s5 + $0x240] ss:$12 sps:$4 sm:$0xff]   ;;  %v1505_v0 = vld [vmem:[%s1949_s5 + $0x25c] ss:$12 sps:$4 sm:$0xff]  }
  0x2c   :  { %1050 = vmatpush1.bf16.msra.mxu0 %v1428_v50  ;;  %v353_v50 = vrot.slane %v1774_v8, %v1839_v45  ;;  %v1512_v8 = vld [vmem:[%s1949_s5 + $0x2a0] ss:$12 sps:$4 sm:$0xff]  }
  0x2d   :  { %1051 = vmatprep.subr.bf16.mxu0 %v1430_v51  ;;  %1348 = vmatpush3.bf16.msra.mxu1 %v1459_v2  ;;  %v1492_v51 = vld [vmem:[%s1949_s5 + $0x214] ss:$12 sps:$4 sm:$0xff]  }
  0x2e   :  { %1355 = vmatprep.subr.bf16.mxu1 %v1463_v4  ;;  %v1508_v2 = vld [vmem:[%s1949_s5 + $0x274] ss:$12 sps:$4 sm:$0xff]   ;;  %v1511_v4 = vld [vmem:[%s1949_s5 + $0x28c] ss:$12 sps:$4 sm:$0xff]  }
  0x30   :  { %1052 = vmatpush1.bf16.msra.mxu0 %v1433_v52  ;;  %v1493_v52 = vld [vmem:[%s1949_s5 + $0x2d8] ss:$12 sps:$4 sm:$0xff]  }
  0x31   :  { %1053 = vmatprep.subr.bf16.mxu0 %v1435_v53  ;;  %v1490_v53 = vld [vmem:[%s1949_s5 + $0x210] ss:$12 sps:$4 sm:$0xff]  }
  0x34   :  { %1054 = vmatpush1.bf16.msra.mxu0 %v1438_v54  ;;  %v1494_v54 = vld [vmem:[%s1949_s5 + $0x218] ss:$12 sps:$4 sm:$0xff]  }
  0x35   :  { %1055 = vmatprep.subr.bf16.mxu0 %v1440_v55 }
  0x38   :  { %1056 = vmatpush1.bf16.msra.mxu0 %v1443_v56  ;;  %v1497_v56 = vld [vmem:[%s1949_s5 + $0x22c] ss:$12 sps:$4 sm:$0xff]  }
  0x39   :  { %1057 = vmatprep.subr.bf16.mxu0 %v1445_v57  ;;  %v1498_v57 = vld [vmem:[%s1949_s5 + $0x2f0] ss:$12 sps:$4 sm:$0xff]  }
  0x3c   :  { %1058 = vmatpush1.bf16.msra.mxu0 %v1448_v58  ;;  %v1495_v58 = vld [vmem:[%s1949_s5 + $0x228] ss:$12 sps:$4 sm:$0xff]  }
  0x3d   :  { %1059 = vmatprep.subr.bf16.mxu0 %v1450_v59  ;;  %v1499_v59 = vld [vmem:[%s1949_s5 + $0x230] ss:$12 sps:$4 sm:$0xff]  }
  0x40   :  { %1060 = vmatpush1.bf16.msra.mxu0 %v1453_v61  ;;  %v1502_v61 = vld [vmem:[%s1949_s5 + $0x244] ss:$12 sps:$4 sm:$0xff]  }
  0x41   :  { %1061 = vmatprep.subr.bf16.mxu0 %v1455_v63 }
  0x44   :  { %1062 = vmatpush1.bf16.msra.mxu0 %v1458_v1  ;;  %v1503_v1 = vld [vmem:[%s1949_s5 + $0x258] ss:$12 sps:$4 sm:$0xff]  }
  0x45   :  { %1072 = vmatprep.subr.bf16.mxu0 %v1462_v3  ;;  %v1506_v3 = vld [vmem:[%s1949_s5 + $0x270] ss:$12 sps:$4 sm:$0xff]  }
  0xdf   :  { %v264_v13 = vpop.f32.mrb[0].mxu1 }
  0xe0   :  { %v362_v14 = vadd.f32 %v345_v10, %v264_v13  ;;  %v266_v15 = vpop.f32.mrb[1].mxu1  ;;  %v1517_v10 = vld [vmem:[%s1949_s5 + $0x2bc] ss:$12 sps:$4 sm:$0xff]  }
  0xe1   :  { %v363_v16 = vadd.f32 %v349_v11, %v266_v15  ;;  %v1515_v11 = vld [vmem:[%s1949_s5 + $0x2b8] ss:$12 sps:$4 sm:$0xff]   ;;  %v1518_v13 = vld [vmem:[%s1949_s5 + $0x2d0] ss:$12 sps:$4 sm:$0xff]   ;;  %v1521_v15 = vld [vmem:[%s1949_s5 + $0x2e8] ss:$12 sps:$4 sm:$0xff]  }
  0xe2   :  { %v366_v18 = vmax.f32 %v362_v14, 0.0  ;;  %v1523_v14 = vld [vmem:[%s1949_s5 + $0x2ec] ss:$12 sps:$4 sm:$0xff]  }
  0xe3   :  { %v367_v19 = vmax.f32 %v363_v16, 0.0  ;;  %v1783_v20 = vpop.f32.mrb[2].mxu1 }
  0xe4   :  { %v337_v21 = vpop.f32.mrb[3].mxu1  ;;  %v370_v26 = vpack.c.bf16 %v366_v18, %v366_v18  ;;  %v364_v55 = vadd.f32 %v353_v50, %v1783_v20 }
  0xe5   :  { %v365_v22 = vadd.f32 %v357_v17, %v337_v21  ;;  %v371_v23 = vpack.c.bf16 %v367_v19, %v367_v19  ;;  %v502_v21 = vld [vmem:[%s1952_s6] sm:$0x7] }
  0xe6   :  { %v368_v60 = vmax.f32 %v364_v55, 0.0 }
  0xe7   :  { %v369_v29 = vmax.f32 %v365_v22, 0.0  ;;  %1063 = vmatprep.mubr.bf16.mxu0 %v371_v23  ;;  %1145 = vmatprep.mubr.bf16.mxu1 %v371_v23  ;;  %v515_v22 = vrot.slane %v502_v21, %v1839_v45 }
  0xe8   :  { %1064 = vmatmul.mubr.bf16.vlgmr.msra.gmra.mrb[0].mxu0 %v370_v26  ;;  %1146 = vmatmul.mubr.bf16.vlgmr.msra.gmra.mrb[4].mxu1 %v370_v26  ;;  %v372_v63 = vpack.c.bf16 %v368_v60, %v368_v60 }
  0xe9   :  { %v373_v30 = vpack.c.bf16 %v369_v29, %v369_v29  ;;  %1073 = vmatpush1.bf16.msra.mxu0 %v1460_v24  ;;  %1356 = vmatpush3.bf16.msra.mxu1 %v1464_v25 }
  0xea   :  { %1074 = vmatprep.subr.bf16.mxu0 %v1467_v27  ;;  %1357 = vmatprep.subr.bf16.mxu1 %v1468_v28 }
  0xeb   :  { %1104 = vmatprep.mubr.bf16.mxu0 %v373_v30  ;;  %1185 = vmatprep.mubr.bf16.mxu1 %v373_v30  ;;  %v507_v30 = vrot.slane %v502_v21, %v1769_v7 }
  0xed   :  { %1075 = vmatpush1.bf16.msra.mxu0 %v1465_v31  ;;  %1358 = vmatpush3.bf16.msra.mxu1 %v1469_v32  ;;  %v511_v31 = vrot.slane %v502_v21, %v1776_v9  ;;  %v1196_v32 = vld [vmem:[%s1953_s7] sm:$0x7] }
  0xee   :  { %1076 = vmatprep.subr.bf16.mxu0 %v1472_v33  ;;  %1359 = vmatprep.subr.bf16.mxu1 %v1473_v34 }
  0xf1   :  { %1077 = vmatpush1.bf16.msra.mxu0 %v1470_v35  ;;  %1360 = vmatpush3.bf16.msra.mxu1 %v1474_v36  ;;  %v1201_v35 = vrot.slane %v1196_v32, %v1769_v7 }
  0xf2   :  { %1078 = vmatprep.subr.bf16.mxu0 %v1477_v37  ;;  %1361 = vmatprep.subr.bf16.mxu1 %v1478_v38 }
  0xf5   :  { %1079 = vmatpush1.bf16.msra.mxu0 %v1475_v39  ;;  %1362 = vmatpush3.bf16.msra.mxu1 %v1479_v40  ;;  %v1205_v39 = vrot.slane %v1196_v32, %v1776_v9  ;;  %v1225_v9 = vstv %s1954_s8 }
  0xf6   :  { %1080 = vmatprep.subr.bf16.mxu0 %v1482_v41  ;;  %1363 = vmatprep.subr.bf16.mxu1 %v1483_v42  ;;  %v1209_v41 = vrot.slane %v1196_v32, %v1839_v45 }
  0xf9   :  { %1081 = vmatpush1.bf16.msra.mxu0 %v1480_v43  ;;  %1364 = vmatpush3.bf16.msra.mxu1 %v1484_v44 }
  0xfa   :  { %1082 = vmatprep.subr.bf16.mxu0 %v1487_v46  ;;  %1365 = vmatprep.subr.bf16.mxu1 %v1488_v47 }
  0xfd   :  { %1083 = vmatpush1.bf16.msra.mxu0 %v1485_v48  ;;  %1366 = vmatpush3.bf16.msra.mxu1 %v1489_v49 }
  0xfe   :  { %1084 = vmatprep.subr.bf16.mxu0 %v1492_v51  ;;  %1367 = vmatprep.subr.bf16.mxu1 %v1493_v52 }
 0x101   :  { %1085 = vmatpush1.bf16.msra.mxu0 %v1490_v53  ;;  %1368 = vmatpush3.bf16.msra.mxu1 %v1494_v54 }
 0x102   :  { %1086 = vmatprep.subr.bf16.mxu0 %v1497_v56  ;;  %1369 = vmatprep.subr.bf16.mxu1 %v1498_v57 }
 0x105   :  { %1087 = vmatpush1.bf16.msra.mxu0 %v1495_v58  ;;  %1370 = vmatpush3.bf16.msra.mxu1 %v1499_v59 }
 0x106   :  { %1088 = vmatprep.subr.bf16.mxu0 %v1502_v61 }
 0x108   :  { %1186 = vmatmul.mubr.bf16.vlgmr.msra.gmra.mrb[8].mxu1 %v372_v63 }
 0x109   :  { %1089 = vmatpush1.bf16.msra.mxu0 %v1500_v62 }
 0x10a   :  { %1090 = vmatprep.subr.bf16.mxu0 %v1505_v0 }
 0x10d   :  { %1091 = vmatpush1.bf16.msra.mxu0 %v1503_v1 }
 0x10e   :  { %1092 = vmatprep.subr.bf16.mxu0 %v1508_v2 }
 0x111   :  { %1093 = vmatpush1.bf16.msra.mxu0 %v1506_v3 }
 0x112   :  { %1094 = vmatprep.subr.bf16.mxu0 %v1511_v4 }
 0x115   :  { %1095 = vmatpush1.bf16.msra.mxu0 %v1509_v5 }
 0x116   :  { %1096 = vmatprep.subr.bf16.mxu0 %v1514_v6 }
 0x119   :  { %1097 = vmatpush1.bf16.msra.mxu0 %v1512_v8 }
 0x11a   :  { %1098 = vmatprep.subr.bf16.mxu0 %v1517_v10 }
 0x11d   :  { %1099 = vmatpush1.bf16.msra.mxu0 %v1515_v11 }
 0x11e   :  { %1100 = vmatprep.subr.bf16.mxu0 %v1520_v12 }
 0x121   :  { %1101 = vmatpush1.bf16.msra.mxu0 %v1518_v13 }
 0x122   :  { %1102 = vmatprep.subr.bf16.mxu0 %v1523_v14 }
 0x125   :  { %1103 = vmatpush1.bf16.msra.mxu0 %v1521_v15 }
 0x128   :  { %1105 = vmatmul.mubr.bf16.vlgmr.msra.gmra.mrb[0].mxu0 %v372_v63 }
 0x1bb   :  { %v1349_v16 = vpop.f32.mrb[4].mxu1 }
 0x1bc   :  { %v1350_v17 = vpop.f32.mrb[5].mxu1 }
 0x1bd   :  { %v1351_v18 = vadd.f32 %v1350_v17, %v1349_v16  ;;  %v1352_v19 = vpop.f32.mrb[6].mxu1 }
 0x1be   :  { %v1353_v20 = vpop.f32.mrb[7].mxu1 }
 0x1bf   :  { %v1148_v25 = vadd.f32 %v1351_v18, %v515_v22 }
 0x1db   :  { %v1371_v23 = vpop.f32.mrb[8].mxu1 }
 0x1dc   :  { %v1372_v24 = vpop.f32.mrb[9].mxu1 }
 0x1dd   :  { %v1373_v26 = vadd.f32 %v1372_v24, %v1371_v23  ;;  %v1374_v27 = vpop.f32.mrb[10].mxu1 }
 0x1de   :  { %v1375_v28 = vpop.f32.mrb[11].mxu1 }
 0x1df   :  { %v1188_v29 = vadd.f32 %v1373_v26, %v1148_v25 }
 0x1e1   :  { %v1195_v37 = vmax.f32 %v1188_v29, 0.0 }
 0x1e3   :  { %v1215_v48 = vmul.f32 %v1209_v41, %v1195_v37 }
 0x1e5   :  { %v1220_v52 = vsel %vm1216_vm2, %v1215_v48, 0.0 }
 0x1fb   :  { %v1106_v33 = vpop.f32.mrb[0].mxu0 }
 0x1fc   :  { %v1385_v34 = vadd.f32 %v1106_v33, %v507_v30  ;;  %v1108_v36 = vpop.f32.mrb[1].mxu0 }
 0x1fd   :  { %v1386_v38 = vadd.f32 %v1108_v36, %v511_v31  ;;  %v1110_v40 = vpop.f32.mrb[2].mxu0 }
 0x1fe   :  { %v1193_v42 = vmax.f32 %v1385_v34, 0.0  ;;  %v1111_v43 = vpop.f32.mrb[3].mxu0 }
 0x1ff   :  { %v1194_v44 = vmax.f32 %v1386_v38, 0.0 }
 0x200   :  { %v1213_v46 = vmul.f32 %v1201_v35, %v1193_v42 }
 0x201   :  { %v1214_v47 = vmul.f32 %v1205_v39, %v1194_v44 }
 0x202   :  { %v1217_v49 = vsel %vm1216_vm2, %v1213_v46, 0.0 }
 0x203   :  { %v1218_v50 = vsel %vm1216_vm2, %v1214_v47, 0.0 }
 0x204   :  { %v1219_v51 = vadd.f32 %v1218_v50, %v1217_v49 }
 0x206   :  { %v1221_v7 = vadd.f32 %v1220_v52, %v1219_v51 }
 0x208   :  { %1222 = vadd.xlane.f32.xlu0 %v1221_v7 }
 0x295   :  { %v1223_v53 = vpop.xlane.xlu0 %1222 }
 0x296   :  { %v1226_v45 = vadd.f32 %v1225_v9, %v1223_v53 }
 0x298   :  { %1228 = vst.msk [vmem:[%s1955_s9] sm:$0x3] %vm1227_vm3, %v1226_v45 }

</bundles_post_ra>
